<compile_context>
chip_gen: v7x
topology: tpu7x:2x2x1
jax: 0.10.0
libtpu: 0.0.40
codegen_flags: <defaults>
</compile_context>

<pallas_src>
import jax
import jax.numpy as jnp
from jax.experimental import pallas as pl
from jax.experimental.pallas import tpu as pltpu


def _round_up(x, m):
    return ((x + m - 1) // m) * m


def _gaussian_taps(kernel_size, sigma):
    """Normalized 1-D Gaussian taps (separable factor of init_weights)."""
    mean = (kernel_size - 1) / 2.0
    coords = jnp.arange(kernel_size, dtype=jnp.float32)
    g = jnp.exp(-((coords - mean) ** 2) / (2.0 * float(sigma) ** 2))
    return g / jnp.sum(g)


def _downsample_matrix(in_len, kernel_size, stride, taps, wrap):
    """Banded matrix mapping the un-padded axis to the strided blurred axis.

    Wrap-around padding (pad=True) is folded into D (the op is linear), so x
    itself is never padded/copied in HBM: x_pad[p] == x[p % in_len].
    """
    pad = kernel_size - 1 if wrap else 0
    padded_len = in_len + pad
    out_len = (padded_len - kernel_size) // stride + 1
    i = jnp.arange(out_len)[:, None]
    p = jnp.arange(padded_len)[None, :]
    k = p - i * stride
    valid = (k >= 0) & (k < kernel_size)
    D = jnp.where(valid, taps[jnp.clip(k, 0, kernel_size - 1)], 0.0)
    if wrap:
        D = jnp.zeros((out_len, in_len), jnp.float32).at[
            :, jnp.arange(padded_len) % in_len].add(D)
    return D.astype(jnp.float32), int(out_len)


def _gauss_down_kernel_fused(dh_ref, dwt_ref, x_ref, o_ref):
    """Fused path (H multiple of the sublane tile).

    dh_ref : (Ho, H) f32     dwt_ref : (W, Wo) f32
    x_ref  : (Bt*H, W) input dtype      o_ref : (Bt, Ho, Wo) output dtype
    Width contraction for all Bt images in one matmul (M = Bt*H fills MXU),
    then Bt small height contractions, statically unrolled.
    """
    h = dh_ref.shape[1]
    dh = dh_ref[...]
    dwt = dwt_ref[...]
    x = x_ref[...].astype(jnp.float32)                                  # in-kernel upcast
    tmp = jnp.dot(x, dwt, preferred_element_type=jnp.float32)           # (Bt*H, Wo)
    for b in range(o_ref.shape[0]):                                     # static unroll
        out_b = jnp.dot(dh, tmp[b * h:(b + 1) * h, :],
                        preferred_element_type=jnp.float32)             # (Ho, Wo)
        o_ref[b, :, :] = out_b.astype(o_ref.dtype)


def _gauss_down_kernel_batched(dh_ref, dwt_ref, x_ref, o_ref):
    """General path (unaligned H): per-image pair of matmuls, Bt unrolled."""
    dh = dh_ref[...]
    dwt = dwt_ref[...]
    for b in range(x_ref.shape[0]):                                     # static unroll
        xb = x_ref[b, :, :].astype(jnp.float32)
        tmp = jnp.dot(xb, dwt, preferred_element_type=jnp.float32)      # (H, Wo)
        out_b = jnp.dot(dh, tmp, preferred_element_type=jnp.float32)    # (Ho, Wo)
        o_ref[b, :, :] = out_b.astype(o_ref.dtype)


def _choose_batch_tile(B, per_image_bytes, budget_bytes, max_bt):
    """Largest divisor of B that fits the VMEM budget and (when possible)
    still leaves >= 2 grid steps so both v7x TensorCores get work."""
    best = 1
    for d in range(1, min(B, max_bt) + 1):
        if B % d != 0:
            continue
        if d * per_image_bytes > budget_bytes:
            break
        if B // d >= 2 or B == 1:
            best = d
    return best


def gaussian_downsample_forward(x, kernel_size, sigma, stride, pad=False):
    """Pallas equivalent of gaussian_downsample.forward for dim=2."""
    N, C, H, W = x.shape
    orig_dtype = x.dtype
    itemsize = jnp.dtype(orig_dtype).itemsize
    if pad:
        assert kernel_size - 1 <= min(H, W), "wrap padding longer than the image"

    sig = tuple(sigma) if isinstance(sigma, (tuple, list)) else (sigma, sigma)
    Dh, Ho = _downsample_matrix(H, kernel_size, stride,
                                _gaussian_taps(kernel_size, sig[0]), pad)  # (Ho, H)
    Dw, Wo = _downsample_matrix(W, kernel_size, stride,
                                _gaussian_taps(kernel_size, sig[1]), pad)  # (Wo, W)
    DwT = Dw.T                                                             # (W, Wo)

    B = N * C   # Conv2d(1,1): C == 1; extra channels would be filtered independently.

    # --- choose images-per-step (Bt) from a VMEM budget & MXU fill target ---
    sub = 8 * max(1, 4 // itemsize)            # sublane tile incl. dtype packing
    img_bytes = _round_up(H, sub) * _round_up(W, 128) * itemsize
    out_img_bytes = _round_up(Ho, sub) * _round_up(Wo, 128) * itemsize
    max_bt = max(8, -(-256 // H))              # aim M = Bt*H ~ 256 (v6e/v7x MXU)
    Bt = _choose_batch_tile(B, 2 * (img_bytes + out_img_bytes),
                            budget_bytes=8 << 20, max_bt=max_bt)
    grid = (B // Bt,)
    fused = (H % sub == 0)                     # (Bt, H) -> Bt*H collapse is tile-aligned

    # --- explicit VMEM budget (v5e default scoped limit is only 16 MiB) ---
    dh_bytes = _round_up(Ho, 8) * _round_up(H, 128) * 4
    dwt_bytes = _round_up(W, 8) * _round_up(Wo, 128) * 4
    tmp_bytes = (Bt * _round_up(H, 8) + _round_up(Ho, 8)) * _round_up(Wo, 128) * 4
    vmem_bytes = (2 * Bt * (img_bytes + out_img_bytes)   # double-buffered x / out
                  + dh_bytes + dwt_bytes                  # single-buffered constants
                  + tmp_bytes)                            # live f32 intermediates
    vmem_limit = int(min(max(2 * vmem_bytes + (1 << 20), 4 << 20), 100 << 20))

    cost = pl.CostEstimate(
        flops=int(2 * B * (H * W * Wo + Ho * H * Wo)),
        transcendentals=0,
        bytes_accessed=int(B * (H * W + Ho * Wo) * itemsize
                           + (Dh.size + DwT.size) * 4),
    )

    if fused:
        kernel = _gauss_down_kernel_fused
        x_in = x.reshape(B * H, W)                         # metadata-only reshape
        x_spec = pl.BlockSpec((Bt * H, W), lambda i: (i, 0))
    else:
        kernel = _gauss_down_kernel_batched
        x_in = x.reshape(B, H, W)
        x_spec = pl.BlockSpec((Bt, H, W), lambda i: (i, 0, 0))

    def const_spec(shape, mode):
        if mode is None:
            return pl.BlockSpec(shape, lambda i: (0, 0))
        return pl.BlockSpec(shape, lambda i: (0, 0), pipeline_mode=mode)

    def run(const_mode):
        return pl.pallas_call(
            kernel,
            out_shape=jax.ShapeDtypeStruct((B, Ho, Wo), orig_dtype),
            grid_spec=pltpu.PrefetchScalarGridSpec(
                num_scalar_prefetch=0,
                grid=grid,
                in_specs=[
                    const_spec((Ho, H), const_mode),       # D_h   (constant block)
                    const_spec((W, Wo), const_mode),       # D_w^T (constant block)
                    x_spec,                                # Bt images per step
                ],
                out_specs=pl.BlockSpec((Bt, Ho, Wo), lambda i: (i, 0, 0)),
            ),
            compiler_params=pltpu.CompilerParams(
                dimension_semantics=("parallel",),
                vmem_limit_bytes=vmem_limit,
            ),
            cost_estimate=cost,
        )(Dh, DwT, x_in)

    try:
        out = run(pl.Buffered(1))    # constants fetched once, single-buffered
    except Exception:                # fallback: default double-buffering
        out = run(None)

    return out.reshape(N, C, Ho, Wo)


class GaussianDownsample:
    """Mirrors gaussian_downsample(nn.Module) for dim=2, bias=False."""

    def __init__(self, kernel_size, sigma, stride, pad=False, dim=2, bias=False):
        # TODO(synk): dim=3 (Conv3d) branch of the module is not implemented.
        assert dim == 2, "only dim=2 implemented"
        assert not bias, "bias not supported (module default bias=False)"
        self.kernel_size = int(kernel_size)
        self.sigma = sigma
        self.stride = int(stride)
        self.pad = bool(pad)

    def __call__(self, x):
        return gaussian_downsample_forward(
            x, self.kernel_size, self.sigma, self.stride, pad=self.pad)


def _reference(x, kernel_size, sigma, stride, pad=False):
    """Pure-JAX reference: strided cross-correlation with the 2-D Gaussian."""
    padsize = kernel_size - 1
    if pad:
        x = jnp.concatenate([x, x[:, :, :padsize, :]], axis=2)
        x = jnp.concatenate([x, x[:, :, :, :padsize]], axis=3)
    sig = tuple(sigma) if isinstance(sigma, (tuple, list)) else (sigma, sigma)
    gh = _gaussian_taps(kernel_size, sig[0])
    gw = _gaussian_taps(kernel_size, sig[1])
    w = jnp.outer(gh, gw).reshape(1, 1, kernel_size, kernel_size)
    return jax.lax.conv_general_dilated(
        x.astype(jnp.float32), w,
        window_strides=(stride, stride), padding="VALID",
        dimension_numbers=("NCHW", "OIHW", "NCHW"))


if __name__ == "__main__":
    key = jax.random.PRNGKey(0)
    kernel_size, sigma, stride = 5, 1.0, 2

    # Conv2d(1, 1, ...) -> single-channel NCHW input.
    configs = [
        dict(shape=(4, 1, 16, 16), pad=False),   # aligned H: fused MXU path
        dict(shape=(4, 1, 16, 16), pad=True),    # wrap padding folded into D
        dict(shape=(3, 1, 15, 15), pad=False),   # unaligned H: per-image path
    ]
    for cfg in configs:
        key, sub = jax.random.split(key)
        x = jax.random.normal(sub, cfg["shape"], dtype=jnp.float32)
        layer = GaussianDownsample(kernel_size, sigma, stride, pad=cfg["pad"])
        y = jax.block_until_ready(layer(x))
        expected = _reference(x, kernel_size, sigma, stride, pad=cfg["pad"])
        assert y.shape == expected.shape, (y.shape, expected.shape)
        assert jnp.allclose(y.astype(jnp.float32), expected, atol=2e-5, rtol=2e-5), (
            cfg, float(jnp.max(jnp.abs(y.astype(jnp.float32) - expected))))

    print("KERNEL_OK")
</pallas_src>

<mosaic_0001>
module attributes {stable_mosaic.version = 11 : i64} {
  func.func @_gauss_down_kernel_fused(%arg0: i32, %arg1: memref<6x16xf32, #tpu.memory_space<vmem>>, %arg2: memref<16x6xf32, #tpu.memory_space<vmem>>, %arg3: memref<32x16xf32, #tpu.memory_space<vmem>>, %arg4: memref<2x6x6xf32, #tpu.memory_space<vmem>>) attributes {dimension_semantics = [#tpu.dimension_semantics<parallel>], iteration_bounds = array<i64: 2>, scalar_prefetch = 0 : i64, scratch_operands = 0 : i64, tpu.core_type = #tpu.core_type<tc>, window_params = [{pipeline_mode = #tpu.pipeline_mode<synchronous>, transform_indices = @transform_0, window_bounds = array<i64: 6, 16>}, {pipeline_mode = #tpu.pipeline_mode<synchronous>, transform_indices = @transform_1, window_bounds = array<i64: 16, 6>}, {transform_indices = @transform_2, window_bounds = array<i64: 32, 16>}, {transform_indices = @transform_3, window_bounds = array<i64: 2, 6, 6>}]} {
    %c0 = arith.constant 0 : index
    %c0_0 = arith.constant 0 : index
    %0 = vector.load %arg1[%c0, %c0_0] : memref<6x16xf32, #tpu.memory_space<vmem>>, vector<6x16xf32>
    %c0_1 = arith.constant 0 : index
    %c0_2 = arith.constant 0 : index
    %1 = vector.load %arg2[%c0_1, %c0_2] : memref<16x6xf32, #tpu.memory_space<vmem>>, vector<16x6xf32>
    %c0_3 = arith.constant 0 : index
    %c0_4 = arith.constant 0 : index
    %2 = vector.load %arg3[%c0_3, %c0_4] : memref<32x16xf32, #tpu.memory_space<vmem>>, vector<32x16xf32>
    %cst = arith.constant dense<0.000000e+00> : vector<32x6xf32>
    %3 = tpu.matmul %2, %1, %cst {dimension_numbers = #tpu.dot_dimension_numbers<[1], [0], [0], [1], [0, 0, 1, 1], [], []>} : vector<32x16xf32>, vector<16x6xf32>, vector<32x6xf32> -> vector<32x6xf32>
    %4 = vector.extract_strided_slice %3 {offsets = [0, 0], sizes = [16, 6], strides = [1, 1]} : vector<32x6xf32> to vector<16x6xf32>
    %cst_5 = arith.constant dense<0.000000e+00> : vector<6x6xf32>
    %5 = tpu.matmul %0, %4, %cst_5 {dimension_numbers = #tpu.dot_dimension_numbers<[1], [0], [0], [1], [0, 0, 1, 1], [], []>} : vector<6x16xf32>, vector<16x6xf32>, vector<6x6xf32> -> vector<6x6xf32>
    %c0_6 = arith.constant 0 : index
    %c0_7 = arith.constant 0 : index
    %c0_8 = arith.constant 0 : index
    %6 = vector.load %arg4[%c0_6, %c0_7, %c0_8] : memref<2x6x6xf32, #tpu.memory_space<vmem>>, vector<1x6x6xf32>
    %7 = vector.shape_cast %6 : vector<1x6x6xf32> to vector<6x6xf32>
    %8 = vector.shape_cast %5 : vector<6x6xf32> to vector<1x6x6xf32>
    tpu.vector_store %arg4[%c0_6, %c0_7, %c0_8], %8 {strides = array<i32>} : memref<2x6x6xf32, #tpu.memory_space<vmem>>, vector<1x6x6xf32>,
    %9 = vector.extract_strided_slice %3 {offsets = [16, 0], sizes = [16, 6], strides = [1, 1]} : vector<32x6xf32> to vector<16x6xf32>
    %cst_9 = arith.constant dense<0.000000e+00> : vector<6x6xf32>
    %10 = tpu.matmul %0, %9, %cst_9 {dimension_numbers = #tpu.dot_dimension_numbers<[1], [0], [0], [1], [0, 0, 1, 1], [], []>} : vector<6x16xf32>, vector<16x6xf32>, vector<6x6xf32> -> vector<6x6xf32>
    %c1 = arith.constant 1 : index
    %c0_10 = arith.constant 0 : index
    %c0_11 = arith.constant 0 : index
    %11 = vector.load %arg4[%c1, %c0_10, %c0_11] : memref<2x6x6xf32, #tpu.memory_space<vmem>>, vector<1x6x6xf32>
    %12 = vector.shape_cast %11 : vector<1x6x6xf32> to vector<6x6xf32>
    %13 = vector.shape_cast %10 : vector<6x6xf32> to vector<1x6x6xf32>
    tpu.vector_store %arg4[%c1, %c0_10, %c0_11], %13 {strides = array<i32>} : memref<2x6x6xf32, #tpu.memory_space<vmem>>, vector<1x6x6xf32>,
    return
  }
  func.func @transform_0(%arg0: i32) -> (i32, i32) {
    %c0_i32 = arith.constant 0 : i32
    %c0_i32_0 = arith.constant 0 : i32
    %c0_i32_1 = arith.constant 0 : i32
    return %c0_i32, %c0_i32_0 : i32, i32
  }
  func.func @transform_1(%arg0: i32) -> (i32, i32) {
    %c0_i32 = arith.constant 0 : i32
    %c0_i32_0 = arith.constant 0 : i32
    %c0_i32_1 = arith.constant 0 : i32
    return %c0_i32, %c0_i32_0 : i32, i32
  }
  func.func @transform_2(%arg0: i32) -> (i32, i32) {
    %c0_i32 = arith.constant 0 : i32
    %c0_i32_0 = arith.constant 0 : i32
    return %arg0, %c0_i32 : i32, i32
  }
  func.func @transform_3(%arg0: i32) -> (i32, i32, i32) {
    %c0_i32 = arith.constant 0 : i32
    %c0_i32_0 = arith.constant 0 : i32
    %c0_i32_1 = arith.constant 0 : i32
    return %arg0, %c0_i32, %c0_i32_0 : i32, i32, i32
  }
}

module attributes {stable_mosaic.version = 11 : i64} {
  func.func @_gauss_down_kernel_fused(%arg0: i32, %arg1: memref<6x16xf32, #tpu.memory_space<vmem>>, %arg2: memref<16x6xf32, #tpu.memory_space<vmem>>, %arg3: memref<32x16xf32, #tpu.memory_space<vmem>>, %arg4: memref<2x6x6xf32, #tpu.memory_space<vmem>>) attributes {dimension_semantics = [#tpu.dimension_semantics<parallel>], iteration_bounds = array<i64: 2>, scalar_prefetch = 0 : i64, scratch_operands = 0 : i64, tpu.core_type = #tpu.core_type<tc>, window_params = [{pipeline_mode = #tpu.pipeline_mode<synchronous>, transform_indices = @transform_0, window_bounds = array<i64: 6, 16>}, {pipeline_mode = #tpu.pipeline_mode<synchronous>, transform_indices = @transform_1, window_bounds = array<i64: 16, 6>}, {transform_indices = @transform_2, window_bounds = array<i64: 32, 16>}, {transform_indices = @transform_3, window_bounds = array<i64: 2, 6, 6>}]} {
    %c0 = arith.constant 0 : index
    %c0_0 = arith.constant 0 : index
    %0 = vector.load %arg1[%c0, %c0_0] : memref<6x16xf32, #tpu.memory_space<vmem>>, vector<6x16xf32>
    %c0_1 = arith.constant 0 : index
    %c0_2 = arith.constant 0 : index
    %1 = vector.load %arg2[%c0_1, %c0_2] : memref<16x6xf32, #tpu.memory_space<vmem>>, vector<16x6xf32>
    %c0_3 = arith.constant 0 : index
    %c0_4 = arith.constant 0 : index
    %2 = vector.load %arg3[%c0_3, %c0_4] : memref<32x16xf32, #tpu.memory_space<vmem>>, vector<32x16xf32>
    %cst = arith.constant dense<0.000000e+00> : vector<32x6xf32>
    %3 = tpu.matmul %2, %1, %cst {dimension_numbers = #tpu.dot_dimension_numbers<[1], [0], [0], [1], [0, 0, 1, 1], [], []>} : vector<32x16xf32>, vector<16x6xf32>, vector<32x6xf32> -> vector<32x6xf32>
    %4 = vector.extract_strided_slice %3 {offsets = [0, 0], sizes = [16, 6], strides = [1, 1]} : vector<32x6xf32> to vector<16x6xf32>
    %cst_5 = arith.constant dense<0.000000e+00> : vector<6x6xf32>
    %5 = tpu.matmul %0, %4, %cst_5 {dimension_numbers = #tpu.dot_dimension_numbers<[1], [0], [0], [1], [0, 0, 1, 1], [], []>} : vector<6x16xf32>, vector<16x6xf32>, vector<6x6xf32> -> vector<6x6xf32>
    %c0_6 = arith.constant 0 : index
    %c0_7 = arith.constant 0 : index
    %c0_8 = arith.constant 0 : index
    %6 = vector.load %arg4[%c0_6, %c0_7, %c0_8] : memref<2x6x6xf32, #tpu.memory_space<vmem>>, vector<1x6x6xf32>
    %7 = vector.shape_cast %6 : vector<1x6x6xf32> to vector<6x6xf32>
    %8 = vector.shape_cast %5 : vector<6x6xf32> to vector<1x6x6xf32>
    tpu.vector_store %arg4[%c0_6, %c0_7, %c0_8], %8 {strides = array<i32>} : memref<2x6x6xf32, #tpu.memory_space<vmem>>, vector<1x6x6xf32>,
    %9 = vector.extract_strided_slice %3 {offsets = [16, 0], sizes = [16, 6], strides = [1, 1]} : vector<32x6xf32> to vector<16x6xf32>
    %cst_9 = arith.constant dense<0.000000e+00> : vector<6x6xf32>
    %10 = tpu.matmul %0, %9, %cst_9 {dimension_numbers = #tpu.dot_dimension_numbers<[1], [0], [0], [1], [0, 0, 1, 1], [], []>} : vector<6x16xf32>, vector<16x6xf32>, vector<6x6xf32> -> vector<6x6xf32>
    %c1 = arith.constant 1 : index
    %c0_10 = arith.constant 0 : index
    %c0_11 = arith.constant 0 : index
    %11 = vector.load %arg4[%c1, %c0_10, %c0_11] : memref<2x6x6xf32, #tpu.memory_space<vmem>>, vector<1x6x6xf32>
    %12 = vector.shape_cast %11 : vector<1x6x6xf32> to vector<6x6xf32>
    %13 = vector.shape_cast %10 : vector<6x6xf32> to vector<1x6x6xf32>
    tpu.vector_store %arg4[%c1, %c0_10, %c0_11], %13 {strides = array<i32>} : memref<2x6x6xf32, #tpu.memory_space<vmem>>, vector<1x6x6xf32>,
    return
  }
  func.func @transform_0(%arg0: i32) -> (i32, i32) {
    %c0_i32 = arith.constant 0 : i32
    %c0_i32_0 = arith.constant 0 : i32
    %c0_i32_1 = arith.constant 0 : i32
    return %c0_i32, %c0_i32_0 : i32, i32
  }
  func.func @transform_1(%arg0: i32) -> (i32, i32) {
    %c0_i32 = arith.constant 0 : i32
    %c0_i32_0 = arith.constant 0 : i32
    %c0_i32_1 = arith.constant 0 : i32
    return %c0_i32, %c0_i32_0 : i32, i32
  }
  func.func @transform_2(%arg0: i32) -> (i32, i32) {
    %c0_i32 = arith.constant 0 : i32
    %c0_i32_0 = arith.constant 0 : i32
    return %arg0, %c0_i32 : i32, i32
  }
  func.func @transform_3(%arg0: i32) -> (i32, i32, i32) {
    %c0_i32 = arith.constant 0 : i32
    %c0_i32_0 = arith.constant 0 : i32
    %c0_i32_1 = arith.constant 0 : i32
    return %arg0, %c0_i32, %c0_i32_0 : i32, i32, i32
  }
}

</mosaic_0001>

<bundles_post_ra>
// kernel: tpu_custom_call.1
= control target key start
LH: loop header
LB: loop body
LE: loop exit
PB: predicated region body
PF: predicated region fallthrough
CT: control target
= control target key end

     0   :  { %s588_s12 = smov 0   ;;  %s624_s0 = inlined_call_operand.vmem [shape: f32[6,16], index: 0, kind: input, shape index: {}]   ;;  %s625_s1 = inlined_call_operand.vmem [shape: f32[16,6], index: 1, kind: input, shape index: {}]   ;;  %s626_s2 = inlined_call_operand.vmem [shape: f32[64,16], index: 2, kind: input, shape index: {}]   ;;  %s627_s3 = inlined_call_operand.vmem [shape: f32[4,6,6], index: 3, kind: output, shape index: {}]  }
   0x1 LB: > { %s482_s13 = sadd.s32 4294967295, %s563_s12   ;;  %p486_p0 = scmp.ge.s32.totalorder %s563_s12, 1  ;;  %s563_s12 = sphi %s588_s12, %s13_s12  }
   0x2   : > { %p138_p1 = scmp.lt.s32.totalorder %s563_s12, 3 }
   0x4   : > { %p139_p2 = pnand %p486_p0, %p138_p1 }
   0x5   : > { %v175_v0 = vld [vmem:[%s625_s1] sm:$0xff] (!%p139_p2)  ;;  %v176_v1 = vld [vmem:[%s625_s1 + $0x8] sm:$0xff] (!%p139_p2)  ;;  %s487_s18 = sshll.u32 (!%p139_p2), %s482_s13, 2  ;;  %vm181_vm0 = vcmask (!%p139_p2), 130048   ;;  %v565_v7 = vmov (!%p139_p2), 0.0|0.0   ;;  %vm566_vm1 = vmmov (!%p139_p2), 0  }
   0x6   : > { %142 = sbr.rel (%p139_p2) target bundleno = 453 (0x1c5), region = 32  ;;  %v536_v2 = vpack.c.bf16 (!%p139_p2), %v176_v1, %v175_v0  ;;  %p163_p3 = scmp.lt.s32.totalorder (!%p139_p2), %s487_s18, 7  ;;  %540 = vmatprep.subr.bf16.mxu1 (!%p139_p2), %v565_v7  ;;  %v567_v8 = vmov (!%p139_p2), 0.0   ;;  %v174_v13 = vld [vmem:[%s624_s0] sm:$0x3f] (!%p139_p2)  ;;  %vm352_vm2 = vcmask (!%p139_p2), 46080  }
   0x7   : > { %526 = vmatprep.mubr.msk.f32.mxu1 (!%p139_p2), %vm566_vm1, %v567_v8  ;;  %s489_s25 = sshll.u32 (!%p139_p2), %s482_s13, 1 }
   0x8   : > { %537 = vmatprep.subr.bf16.mxu0 (!%p139_p2), %v536_v2  ;;  %p169_p4 = scmp.lt.s32.totalorder (!%p139_p2), %s489_s25, 3 }
   0x9   : > { %539 = vmatpush3.bf16.msra.mxu0 (!%p139_p2), %v536_v2 }
   0xd   : > { %s629_s18 = smov (!%p163_p3, %s487_s18), 7  ;;  %s631_s25 = smov (!%p169_p4, %s489_s25), 3 }
   0xe   : > { %s488_s19 = sshll.u32 %s629_s18, 3  ;;  %s490_s26 = sshll.u32 %s631_s25, 3 }
   0xf   : > { %s166_s22 = scalar_lea.vmem %s626_s2, %s488_s19  ;;  %s172_s29 = scalar_lea.vmem %s627_s3, %s490_s26 }
  0x10   : > { %v177_v3 = vld [vmem:[%s166_s22] sm:$0xff]  ;;  %v178_v4 = vld [vmem:[%s166_s22 + $0x8] sm:$0xff]  ;;  %v179_v5 = vld [vmem:[%s166_s22 + $0x10] sm:$0xff] }
  0x11   : > { %516 = vmatprep.mubr.msk.f32.mxu0 %vm181_vm0, %v177_v3  ;;  %v180_v6 = vld [vmem:[%s166_s22 + $0x18] sm:$0xff] }
  0x12   : > { %517 = vmatmul.mubr.msk.f32.vlgmr.msra.gmra.mrb[0].mxu0 %vm181_vm0, %v178_v4 }
  0x13   : > { %519 = vmatprep.mubr.msk.f32.mxu0 %vm181_vm0, %v179_v5 }
  0x16   : > { %520 = vmatmul.mubr.msk.f32.gmra.mrb[2].mxu0 %vm181_vm0, %v180_v6 }
  0xe5   : > { %v518_v9 = vpop.f32.mrb[0].mxu0 }
  0xe6   : > { %v260_v10 = vpop.f32.mrb[1].mxu0 }
  0xe7   : > { %v541_v11 = vpack.c.bf16 %v518_v9, %v260_v10 }
  0xe9   : > { %v521_v12 = vpop.f32.mrb[2].mxu0  ;;  %542 = vmatpush3.bf16.msra.mxu1 %v541_v11 }
  0xea   : > { %v270_v14 = vpop.f32.mrb[3].mxu0  ;;  %543 = vmatprep.subr.bf16.mxu1 %v565_v7 }
  0xeb   : > { %v544_v15 = vpack.c.bf16 %v521_v12, %v270_v14 }
  0xec   : > { %527 = vmatmul.mubr.msk.f32.vlgmr.msra.gmra.mrb[0].mxu1 %vm181_vm0, %v174_v13 }
  0xed   : > { %545 = vmatpush3.bf16.msra.mxu1 %v544_v15  ;;  %533 = vmatprep.mubr.msk.f32.mxu1 %vm566_vm1, %v567_v8 }
  0xf0   : > { %534 = vmatmul.mubr.msk.f32.vlgmr.msra.gmra.mrb[2].mxu1 %vm181_vm0, %v174_v13 }
 0x1bf   : > { %v348_v16 = vpop.f32.mrb[0].mxu1 }
 0x1c0   : > { %353 = vst.msk [vmem:[%s172_s29] sm:$0x3f] %vm352_vm2, %v348_v16  ;;  %v528_v17 = vpop.f32.mrb[1].mxu1 }
 0x1c3   : > { %v420_v18 = vpop.f32.mrb[2].mxu1 }
 0x1c4   : > { %497 = vst.msk [vmem:[%s172_s29 + $0x8] sm:$0x3f] %vm352_vm2, %v420_v18  ;;  %v535_v19 = vpop.f32.mrb[3].mxu1 }
 0x1c5 PF: > { %s13_s12 = sadd.s32 1, %s563_s12  }
 0x1c6   : > { %p10_p5 = scmp.ge.s32.totalorder %s13_s12, 4  }
 0x1c8   :  { %12 = sbr.rel (!%p10_p5) target bundleno = 1 (0x1), region = 63 }

// kernel: tpu_custom_call.1
= control target key start
LH: loop header
LB: loop body
LE: loop exit
PB: predicated region body
PF: predicated region fallthrough
CT: control target
= control target key end

     0   :  { %s588_s12 = smov 0   ;;  %s624_s0 = inlined_call_operand.vmem [shape: f32[6,16], index: 0, kind: input, shape index: {}]   ;;  %s625_s1 = inlined_call_operand.vmem [shape: f32[16,6], index: 1, kind: input, shape index: {}]   ;;  %s626_s2 = inlined_call_operand.vmem [shape: f32[64,16], index: 2, kind: input, shape index: {}]   ;;  %s627_s3 = inlined_call_operand.vmem [shape: f32[4,6,6], index: 3, kind: output, shape index: {}]  }
   0x1 LB: > { %s482_s13 = sadd.s32 4294967295, %s563_s12   ;;  %p486_p0 = scmp.ge.s32.totalorder %s563_s12, 1  ;;  %s563_s12 = sphi %s588_s12, %s13_s12  }
   0x2   : > { %p138_p1 = scmp.lt.s32.totalorder %s563_s12, 3 }
   0x4   : > { %p139_p2 = pnand %p486_p0, %p138_p1 }
   0x5   : > { %v175_v0 = vld [vmem:[%s625_s1] sm:$0xff] (!%p139_p2)  ;;  %v176_v1 = vld [vmem:[%s625_s1 + $0x8] sm:$0xff] (!%p139_p2)  ;;  %s487_s18 = sshll.u32 (!%p139_p2), %s482_s13, 2  ;;  %vm181_vm0 = vcmask (!%p139_p2), 130048   ;;  %v565_v7 = vmov (!%p139_p2), 0.0|0.0   ;;  %vm566_vm1 = vmmov (!%p139_p2), 0  }
   0x6   : > { %142 = sbr.rel (%p139_p2) target bundleno = 453 (0x1c5), region = 32  ;;  %v536_v2 = vpack.c.bf16 (!%p139_p2), %v176_v1, %v175_v0  ;;  %p163_p3 = scmp.lt.s32.totalorder (!%p139_p2), %s487_s18, 7  ;;  %540 = vmatprep.subr.bf16.mxu1 (!%p139_p2), %v565_v7  ;;  %v567_v8 = vmov (!%p139_p2), 0.0   ;;  %v174_v13 = vld [vmem:[%s624_s0] sm:$0x3f] (!%p139_p2)  ;;  %vm352_vm2 = vcmask (!%p139_p2), 46080  }
   0x7   : > { %526 = vmatprep.mubr.msk.f32.mxu1 (!%p139_p2), %vm566_vm1, %v567_v8  ;;  %s489_s25 = sshll.u32 (!%p139_p2), %s482_s13, 1 }
   0x8   : > { %537 = vmatprep.subr.bf16.mxu0 (!%p139_p2), %v536_v2  ;;  %p169_p4 = scmp.lt.s32.totalorder (!%p139_p2), %s489_s25, 3 }
   0x9   : > { %539 = vmatpush3.bf16.msra.mxu0 (!%p139_p2), %v536_v2 }
   0xd   : > { %s629_s18 = smov (!%p163_p3, %s487_s18), 7  ;;  %s631_s25 = smov (!%p169_p4, %s489_s25), 3 }
   0xe   : > { %s488_s19 = sshll.u32 %s629_s18, 3  ;;  %s490_s26 = sshll.u32 %s631_s25, 3 }
   0xf   : > { %s166_s22 = scalar_lea.vmem %s626_s2, %s488_s19  ;;  %s172_s29 = scalar_lea.vmem %s627_s3, %s490_s26 }
  0x10   : > { %v177_v3 = vld [vmem:[%s166_s22] sm:$0xff]  ;;  %v178_v4 = vld [vmem:[%s166_s22 + $0x8] sm:$0xff]  ;;  %v179_v5 = vld [vmem:[%s166_s22 + $0x10] sm:$0xff] }
  0x11   : > { %516 = vmatprep.mubr.msk.f32.mxu0 %vm181_vm0, %v177_v3  ;;  %v180_v6 = vld [vmem:[%s166_s22 + $0x18] sm:$0xff] }
  0x12   : > { %517 = vmatmul.mubr.msk.f32.vlgmr.msra.gmra.mrb[0].mxu0 %vm181_vm0, %v178_v4 }
  0x13   : > { %519 = vmatprep.mubr.msk.f32.mxu0 %vm181_vm0, %v179_v5 }
  0x16   : > { %520 = vmatmul.mubr.msk.f32.gmra.mrb[2].mxu0 %vm181_vm0, %v180_v6 }
  0xe5   : > { %v518_v9 = vpop.f32.mrb[0].mxu0 }
  0xe6   : > { %v260_v10 = vpop.f32.mrb[1].mxu0 }
  0xe7   : > { %v541_v11 = vpack.c.bf16 %v518_v9, %v260_v10 }
  0xe9   : > { %v521_v12 = vpop.f32.mrb[2].mxu0  ;;  %542 = vmatpush3.bf16.msra.mxu1 %v541_v11 }
  0xea   : > { %v270_v14 = vpop.f32.mrb[3].mxu0  ;;  %543 = vmatprep.subr.bf16.mxu1 %v565_v7 }
  0xeb   : > { %v544_v15 = vpack.c.bf16 %v521_v12, %v270_v14 }
  0xec   : > { %527 = vmatmul.mubr.msk.f32.vlgmr.msra.gmra.mrb[0].mxu1 %vm181_vm0, %v174_v13 }
  0xed   : > { %545 = vmatpush3.bf16.msra.mxu1 %v544_v15  ;;  %533 = vmatprep.mubr.msk.f32.mxu1 %vm566_vm1, %v567_v8 }
  0xf0   : > { %534 = vmatmul.mubr.msk.f32.vlgmr.msra.gmra.mrb[2].mxu1 %vm181_vm0, %v174_v13 }
 0x1bf   : > { %v348_v16 = vpop.f32.mrb[0].mxu1 }
 0x1c0   : > { %353 = vst.msk [vmem:[%s172_s29] sm:$0x3f] %vm352_vm2, %v348_v16  ;;  %v528_v17 = vpop.f32.mrb[1].mxu1 }
 0x1c3   : > { %v420_v18 = vpop.f32.mrb[2].mxu1 }
 0x1c4   : > { %497 = vst.msk [vmem:[%s172_s29 + $0x8] sm:$0x3f] %vm352_vm2, %v420_v18  ;;  %v535_v19 = vpop.f32.mrb[3].mxu1 }
 0x1c5 PF: > { %s13_s12 = sadd.s32 1, %s563_s12  }
 0x1c6   : > { %p10_p5 = scmp.ge.s32.totalorder %s13_s12, 4  }
 0x1c8   :  { %12 = sbr.rel (!%p10_p5) target bundleno = 1 (0x1), region = 63 }

</bundles_post_ra>
